<compile_context>
chip_gen: v7x
topology: tpu7x:2x2x1
jax: 0.10.0
libtpu: 0.0.40
codegen_flags: <defaults>
</compile_context>

<pallas_src>
import functools
import math

import jax
import jax.numpy as jnp
from jax.experimental import pallas as pl
from jax.experimental.pallas import tpu as pltpu


def _sigv_flash_kernel(q_ref, k_ref, v_ref, o_ref,
                       qs_sc, m_sc, l_sc, acc_sc, *, scale, mm_dtype):
    # Blocks: q/o -> (1, 1, tq, D), k/v -> (1, 1, tk, D), one (b, h) at a time.
    # v_ref already holds sigmoid(v) in mm_dtype (precomputed in the wrapper).
    ki = pl.program_id(3)

    @pl.when(ki == 0)
    def _():
        # Loop-invariant work hoisted out of the kv loop: scale + MXU cast of
        # the q tile (computed once per (b, h, q-tile)), accumulator init.
        qs_sc[...] = (q_ref[0, 0].astype(jnp.float32) * scale).astype(mm_dtype)
        m_sc[...] = jnp.full_like(m_sc, -jnp.inf)
        l_sc[...] = jnp.zeros_like(l_sc)
        acc_sc[...] = jnp.zeros_like(acc_sc)

    # s = (q / sqrt(d)) @ k^T without materializing k^T: contract D of both.
    # Operands in mm_dtype (bf16 for f32 callers), f32 accumulation on MXU.
    k = k_ref[0, 0].astype(mm_dtype)                        # (tk, D)
    s = jax.lax.dot_general(
        qs_sc[...], k,
        dimension_numbers=(((1,), (1,)), ((), ())),
        preferred_element_type=jnp.float32,
    )                                                       # (tq, tk) f32

    # Online (streaming) softmax update; transcendentals stay f32 on EUP
    # (safe on v5e which has no bf16 EUP/VPU).
    m_prev = m_sc[...]                                      # (tq, 1)
    m_new = jnp.maximum(m_prev, jnp.max(s, axis=-1, keepdims=True))
    alpha = jnp.exp(m_prev - m_new)                         # rescale old stats
    p = jnp.exp(s - m_new)                                  # (tq, tk) f32

    l_sc[...] = alpha * l_sc[...] + jnp.sum(p, axis=-1, keepdims=True)
    acc_sc[...] = alpha * acc_sc[...] + jnp.dot(
        p.astype(mm_dtype), v_ref[0, 0], preferred_element_type=jnp.float32)
    m_sc[...] = m_new

    @pl.when(ki == pl.num_programs(3) - 1)
    def _():
        inv_l = pl.reciprocal(l_sc[...], approx=True)       # EUP vrcp, finalize once
        o_ref[0, 0] = (acc_sc[...] * inv_l).astype(o_ref.dtype)


def _pick_tile(length, target, min_multiple=8):
    """Largest tile <= min(target, length) dividing `length`, preferring
    MXU / lane-friendly sizes and respecting dtype sublane packing."""
    t = min(target, length)
    if length % t == 0 and t % min_multiple == 0:
        return t
    for cand in (1024, 896, 768, 640, 512, 384, 256, 128, 64, 32, 16, 8):
        if cand <= t and length % cand == 0 and cand % min_multiple == 0:
            return cand
    return length  # full extent is always a legal block dim


def sigv_attention(q, k, v, *, block_q=512, block_kv=256):
    """q, k, v: (B, H, L, D). Returns softmax(q k^T / sqrt(D)) @ sigmoid(v)."""
    B, H, L, D = k.shape
    assert q.shape == (B, H, L, D) and v.shape == (B, H, L, D)

    # MXU-native operand dtype: f32 callers get bf16 operands (accumulation
    # stays f32); bf16 / f16 callers keep their dtype.
    mm_dtype = jnp.bfloat16 if q.dtype == jnp.float32 else q.dtype

    # Hoist sigmoid(V) out of the kv inner loop: one elementwise pass over V
    # here instead of a sigmoid on every (q-tile, kv-tile) pair inside the
    # kernel.  Stored in mm_dtype so the kernel streams it MXU-ready (and at
    # half the HBM bytes for f32 callers).
    v_sig = jax.nn.sigmoid(v.astype(jnp.float32)).astype(mm_dtype)

    # Sub-32-bit dtypes pack rows along sublanes -> require 16-row tiles for
    # bf16 (32 for 1-byte dtypes) to avoid padded vregs / masked stores.
    min_mult = {4: 8, 2: 16, 1: 32}[jnp.dtype(mm_dtype).itemsize]
    tq = _pick_tile(L, block_q, min_mult)
    tk = _pick_tile(L, block_kv, min_mult)
    scale = 1.0 / math.sqrt(D)

    # Parallel axes B, H, L/tq feed megacore / v7x dual-TC; kv is the
    # innermost "arbitrary" reduction.  (For B=H=1 workloads keep L/tq >= 2.)
    grid = (B, H, L // tq, L // tk)

    q_spec = pl.BlockSpec((1, 1, tq, D), lambda b, h, qi, ki: (b, h, qi, 0))
    kv_spec = pl.BlockSpec((1, 1, tk, D), lambda b, h, qi, ki: (b, h, ki, 0))
    o_spec = pl.BlockSpec((1, 1, tq, D), lambda b, h, qi, ki: (b, h, qi, 0))

    kernel = functools.partial(_sigv_flash_kernel, scale=scale, mm_dtype=mm_dtype)

    return pl.pallas_call(
        kernel,
        out_shape=jax.ShapeDtypeStruct((B, H, L, D), q.dtype),
        grid_spec=pltpu.PrefetchScalarGridSpec(
            num_scalar_prefetch=0,
            grid=grid,
            in_specs=[q_spec, kv_spec, kv_spec],
            out_specs=o_spec,
            scratch_shapes=[
                pltpu.VMEM((tq, D), mm_dtype),      # scaled + cast q tile
                pltpu.VMEM((tq, 1), jnp.float32),   # running max  m_i
                pltpu.VMEM((tq, 1), jnp.float32),   # running sum  l_i
                pltpu.VMEM((tq, D), jnp.float32),   # output accumulator
            ],
        ),
        compiler_params=pltpu.CompilerParams(
            dimension_semantics=("parallel", "parallel", "parallel", "arbitrary"),
        ),
    )(q, k, v_sig)


def _reference(q, k, v):
    d = k.shape[-1]
    score = jnp.einsum(
        "bhld,bhmd->bhlm", q.astype(jnp.float32), k.astype(jnp.float32)
    ) / math.sqrt(d)
    p = jax.nn.softmax(score, axis=-1)
    out = jnp.einsum("bhlm,bhmd->bhld", p, jax.nn.sigmoid(v.astype(jnp.float32)))
    return out.astype(q.dtype)


if __name__ == "__main__":
    key = jax.random.PRNGKey(0)
    k1, k2, k3, k4, k5, k6 = jax.random.split(key, 6)

    # Case 1: tiny shapes consistent with the module (single q / kv tile).
    B, H, L, D = 2, 2, 8, 32
    q = jax.random.normal(k1, (B, H, L, D), dtype=jnp.float32)
    k = jax.random.normal(k2, (B, H, L, D), dtype=jnp.float32)
    v = jax.random.normal(k3, (B, H, L, D), dtype=jnp.float32)

    out = sigv_attention(q, k, v)
    jax.block_until_ready(out)
    ref = _reference(q, k, v)
    assert out.shape == (B, H, L, D)
    assert jnp.allclose(out, ref, atol=2e-2, rtol=2e-2), "mismatch vs reference (case 1)"

    # Case 2: multiple q / kv tiles to exercise the online-softmax reduction.
    B2, H2, L2, D2 = 2, 2, 256, 32
    q2 = jax.random.normal(k4, (B2, H2, L2, D2), dtype=jnp.float32)
    k2_ = jax.random.normal(k5, (B2, H2, L2, D2), dtype=jnp.float32)
    v2 = jax.random.normal(k6, (B2, H2, L2, D2), dtype=jnp.float32)

    out2 = sigv_attention(q2, k2_, v2, block_q=128, block_kv=128)
    jax.block_until_ready(out2)
    ref2 = _reference(q2, k2_, v2)
    assert jnp.allclose(out2, ref2, atol=2e-2, rtol=2e-2), "mismatch vs reference (case 2)"

    print("KERNEL_OK")
</pallas_src>

<mosaic_0001>
module attributes {stable_mosaic.version = 11 : i64} {
  func.func @_sigv_flash_kernel(%arg0: i32, %arg1: i32, %arg2: i32, %arg3: i32, %arg4: memref<1x1x8x32xf32, #tpu.memory_space<vmem>>, %arg5: memref<1x1x8x32xf32, #tpu.memory_space<vmem>>, %arg6: memref<1x1x8x32xbf16, #tpu.memory_space<vmem>>, %arg7: memref<1x1x8x32xf32, #tpu.memory_space<vmem>>, %arg8: memref<8x32xbf16, #tpu.memory_space<vmem>>, %arg9: memref<8x1xf32, #tpu.memory_space<vmem>>, %arg10: memref<8x1xf32, #tpu.memory_space<vmem>>, %arg11: memref<8x32xf32, #tpu.memory_space<vmem>>) attributes {dimension_semantics = [#tpu.dimension_semantics<parallel>, #tpu.dimension_semantics<parallel>, #tpu.dimension_semantics<parallel>, #tpu.dimension_semantics<arbitrary>], iteration_bounds = array<i64: 2, 2, 1, 1>, scalar_prefetch = 0 : i64, scratch_operands = 4 : i64, tpu.core_type = #tpu.core_type<tc>, window_params = [{transform_indices = @transform_0, window_bounds = array<i64: 1, 1, 8, 32>}, {transform_indices = @transform_1, window_bounds = array<i64: 1, 1, 8, 32>}, {transform_indices = @transform_2, window_bounds = array<i64: 1, 1, 8, 32>}, {transform_indices = @transform_3, window_bounds = array<i64: 1, 1, 8, 32>}]} {
    %c0_i32 = arith.constant 0 : i32
    %0 = arith.cmpi eq, %arg3, %c0_i32 : i32
    %1 = arith.extui %0 : i1 to i32
    %c0_i32_0 = arith.constant 0 : i32
    %2 = arith.cmpi ne, %1, %c0_i32_0 : i32
    scf.if %2 {
      %c0_27 = arith.constant 0 : index
      %c0_28 = arith.constant 0 : index
      %c0_29 = arith.constant 0 : index
      %c0_30 = arith.constant 0 : index
      %36 = vector.load %arg4[%c0_27, %c0_28, %c0_29, %c0_30] : memref<1x1x8x32xf32, #tpu.memory_space<vmem>>, vector<1x1x8x32xf32>
      %37 = vector.shape_cast %36 : vector<1x1x8x32xf32> to vector<8x32xf32>
      %cst_31 = arith.constant 0.176776692 : f32
      %38 = vector.broadcast %cst_31 : f32 to vector<8x32xf32>
      %39 = arith.mulf %37, %38 : vector<8x32xf32>
      %40 = arith.truncf %39 : vector<8x32xf32> to vector<8x32xbf16>
      %c0_32 = arith.constant 0 : index
      %c0_33 = arith.constant 0 : index
      %41 = vector.load %arg8[%c0_32, %c0_33] : memref<8x32xbf16, #tpu.memory_space<vmem>>, vector<8x32xbf16>
      tpu.vector_store %arg8[%c0_32, %c0_33], %40 {strides = array<i32>} : memref<8x32xbf16, #tpu.memory_space<vmem>>, vector<8x32xbf16>,
      %cst_34 = arith.constant 0xFF800000 : f32
      %42 = vector.broadcast %cst_34 : f32 to vector<8x1xf32>
      %c0_35 = arith.constant 0 : index
      %c0_36 = arith.constant 0 : index
      %43 = vector.load %arg9[%c0_35, %c0_36] : memref<8x1xf32, #tpu.memory_space<vmem>>, vector<8x1xf32>
      tpu.vector_store %arg9[%c0_35, %c0_36], %42 {strides = array<i32>} : memref<8x1xf32, #tpu.memory_space<vmem>>, vector<8x1xf32>,
      %cst_37 = arith.constant 0.000000e+00 : f32
      %44 = vector.broadcast %cst_37 : f32 to vector<8x1xf32>
      %c0_38 = arith.constant 0 : index
      %c0_39 = arith.constant 0 : index
      %45 = vector.load %arg10[%c0_38, %c0_39] : memref<8x1xf32, #tpu.memory_space<vmem>>, vector<8x1xf32>
      tpu.vector_store %arg10[%c0_38, %c0_39], %44 {strides = array<i32>} : memref<8x1xf32, #tpu.memory_space<vmem>>, vector<8x1xf32>,
      %cst_40 = arith.constant 0.000000e+00 : f32
      %46 = vector.broadcast %cst_40 : f32 to vector<8x32xf32>
      %c0_41 = arith.constant 0 : index
      %c0_42 = arith.constant 0 : index
      %47 = vector.load %arg11[%c0_41, %c0_42] : memref<8x32xf32, #tpu.memory_space<vmem>>, vector<8x32xf32>
      tpu.vector_store %arg11[%c0_41, %c0_42], %46 {strides = array<i32>} : memref<8x32xf32, #tpu.memory_space<vmem>>, vector<8x32xf32>,
    } else {
    }
    %c0 = arith.constant 0 : index
    %c0_1 = arith.constant 0 : index
    %c0_2 = arith.constant 0 : index
    %c0_3 = arith.constant 0 : index
    %3 = vector.load %arg5[%c0, %c0_1, %c0_2, %c0_3] : memref<1x1x8x32xf32, #tpu.memory_space<vmem>>, vector<1x1x8x32xf32>
    %4 = vector.shape_cast %3 : vector<1x1x8x32xf32> to vector<8x32xf32>
    %5 = arith.truncf %4 : vector<8x32xf32> to vector<8x32xbf16>
    %c0_4 = arith.constant 0 : index
    %c0_5 = arith.constant 0 : index
    %6 = vector.load %arg8[%c0_4, %c0_5] : memref<8x32xbf16, #tpu.memory_space<vmem>>, vector<8x32xbf16>
    %cst = arith.constant dense<0.000000e+00> : vector<8x8xf32>
    %7 = tpu.matmul %6, %5, %cst {dimension_numbers = #tpu.dot_dimension_numbers<[1], [1], [0], [0], [0, 0, 1, 0], [], []>} : vector<8x32xbf16>, vector<8x32xbf16>, vector<8x8xf32> -> vector<8x8xf32>
    %c0_6 = arith.constant 0 : index
    %c0_7 = arith.constant 0 : index
    %8 = vector.load %arg9[%c0_6, %c0_7] : memref<8x1xf32, #tpu.memory_space<vmem>>, vector<8x1xf32>
    %cst_8 = arith.constant dense<0xFF800000> : vector<8xf32>
    %9 = vector.multi_reduction <maximumf>, %7, %cst_8 [1] : vector<8x8xf32> to vector<8xf32>
    %10 = vector.shape_cast %9 : vector<8xf32> to vector<8x1xf32>
    %11 = arith.maximumf %8, %10 : vector<8x1xf32>
    %12 = arith.subf %8, %11 : vector<8x1xf32>
    %13 = math.exp %12 : vector<8x1xf32>
    %14 = vector.broadcast %11 : vector<8x1xf32> to vector<8x8xf32>
    %15 = arith.subf %7, %14 : vector<8x8xf32>
    %16 = math.exp %15 : vector<8x8xf32>
    %c0_9 = arith.constant 0 : index
    %c0_10 = arith.constant 0 : index
    %17 = vector.load %arg10[%c0_9, %c0_10] : memref<8x1xf32, #tpu.memory_space<vmem>>, vector<8x1xf32>
    %18 = arith.mulf %13, %17 : vector<8x1xf32>
    %cst_11 = arith.constant dense<0.000000e+00> : vector<8xf32>
    %19 = vector.multi_reduction <add>, %16, %cst_11 [1] : vector<8x8xf32> to vector<8xf32>
    %20 = vector.shape_cast %19 : vector<8xf32> to vector<8x1xf32>
    %21 = arith.addf %18, %20 : vector<8x1xf32>
    %c0_12 = arith.constant 0 : index
    %c0_13 = arith.constant 0 : index
    %22 = vector.load %arg10[%c0_12, %c0_13] : memref<8x1xf32, #tpu.memory_space<vmem>>, vector<8x1xf32>
    tpu.vector_store %arg10[%c0_12, %c0_13], %21 {strides = array<i32>} : memref<8x1xf32, #tpu.memory_space<vmem>>, vector<8x1xf32>,
    %c0_14 = arith.constant 0 : index
    %c0_15 = arith.constant 0 : index
    %23 = vector.load %arg11[%c0_14, %c0_15] : memref<8x32xf32, #tpu.memory_space<vmem>>, vector<8x32xf32>
    %24 = vector.broadcast %13 : vector<8x1xf32> to vector<8x32xf32>
    %25 = arith.mulf %24, %23 : vector<8x32xf32>
    %26 = arith.truncf %16 : vector<8x8xf32> to vector<8x8xbf16>
    %c0_16 = arith.constant 0 : index
    %c0_17 = arith.constant 0 : index
    %c0_18 = arith.constant 0 : index
    %c0_19 = arith.constant 0 : index
    %27 = vector.load %arg6[%c0_16, %c0_17, %c0_18, %c0_19] : memref<1x1x8x32xbf16, #tpu.memory_space<vmem>>, vector<1x1x8x32xbf16>
    %28 = vector.shape_cast %27 : vector<1x1x8x32xbf16> to vector<8x32xbf16>
    %cst_20 = arith.constant dense<0.000000e+00> : vector<8x32xf32>
    %29 = tpu.matmul %26, %28, %cst_20 {dimension_numbers = #tpu.dot_dimension_numbers<[1], [0], [0], [1], [0, 0, 1, 1], [], []>} : vector<8x8xbf16>, vector<8x32xbf16>, vector<8x32xf32> -> vector<8x32xf32>
    %30 = arith.addf %25, %29 : vector<8x32xf32>
    %c0_21 = arith.constant 0 : index
    %c0_22 = arith.constant 0 : index
    %31 = vector.load %arg11[%c0_21, %c0_22] : memref<8x32xf32, #tpu.memory_space<vmem>>, vector<8x32xf32>
    tpu.vector_store %arg11[%c0_21, %c0_22], %30 {strides = array<i32>} : memref<8x32xf32, #tpu.memory_space<vmem>>, vector<8x32xf32>,
    %c0_23 = arith.constant 0 : index
    %c0_24 = arith.constant 0 : index
    %32 = vector.load %arg9[%c0_23, %c0_24] : memref<8x1xf32, #tpu.memory_space<vmem>>, vector<8x1xf32>
    tpu.vector_store %arg9[%c0_23, %c0_24], %11 {strides = array<i32>} : memref<8x1xf32, #tpu.memory_space<vmem>>, vector<8x1xf32>,
    %c0_i32_25 = arith.constant 0 : i32
    %33 = arith.cmpi eq, %arg3, %c0_i32_25 : i32
    %34 = arith.extui %33 : i1 to i32
    %c0_i32_26 = arith.constant 0 : i32
    %35 = arith.cmpi ne, %34, %c0_i32_26 : i32
    scf.if %35 {
      %c0_27 = arith.constant 0 : index
      %c0_28 = arith.constant 0 : index
      %36 = vector.load %arg10[%c0_27, %c0_28] : memref<8x1xf32, #tpu.memory_space<vmem>>, vector<8x1xf32>
      %37 = tpu.reciprocal %36 {approx = true} : vector<8x1xf32> -> vector<8x1xf32>
      %c0_29 = arith.constant 0 : index
      %c0_30 = arith.constant 0 : index
      %38 = vector.load %arg11[%c0_29, %c0_30] : memref<8x32xf32, #tpu.memory_space<vmem>>, vector<8x32xf32>
      %39 = vector.broadcast %37 : vector<8x1xf32> to vector<8x32xf32>
      %40 = arith.mulf %38, %39 : vector<8x32xf32>
      %c0_31 = arith.constant 0 : index
      %c0_32 = arith.constant 0 : index
      %c0_33 = arith.constant 0 : index
      %c0_34 = arith.constant 0 : index
      %41 = vector.load %arg7[%c0_31, %c0_32, %c0_33, %c0_34] : memref<1x1x8x32xf32, #tpu.memory_space<vmem>>, vector<1x1x8x32xf32>
      %42 = vector.shape_cast %41 : vector<1x1x8x32xf32> to vector<8x32xf32>
      %43 = vector.shape_cast %40 : vector<8x32xf32> to vector<1x1x8x32xf32>
      tpu.vector_store %arg7[%c0_31, %c0_32, %c0_33, %c0_34], %43 {strides = array<i32>} : memref<1x1x8x32xf32, #tpu.memory_space<vmem>>, vector<1x1x8x32xf32>,
    } else {
    }
    return
  }
  func.func @transform_0(%arg0: i32, %arg1: i32, %arg2: i32, %arg3: i32) -> (i32, i32, i32, i32) {
    %c0_i32 = arith.constant 0 : i32
    %c0_i32_0 = arith.constant 0 : i32
    return %arg0, %arg1, %arg2, %c0_i32 : i32, i32, i32, i32
  }
  func.func @transform_1(%arg0: i32, %arg1: i32, %arg2: i32, %arg3: i32) -> (i32, i32, i32, i32) {
    %c0_i32 = arith.constant 0 : i32
    %c0_i32_0 = arith.constant 0 : i32
    return %arg0, %arg1, %arg3, %c0_i32 : i32, i32, i32, i32
  }
  func.func @transform_2(%arg0: i32, %arg1: i32, %arg2: i32, %arg3: i32) -> (i32, i32, i32, i32) {
    %c0_i32 = arith.constant 0 : i32
    %c0_i32_0 = arith.constant 0 : i32
    return %arg0, %arg1, %arg3, %c0_i32 : i32, i32, i32, i32
  }
  func.func @transform_3(%arg0: i32, %arg1: i32, %arg2: i32, %arg3: i32) -> (i32, i32, i32, i32) {
    %c0_i32 = arith.constant 0 : i32
    %c0_i32_0 = arith.constant 0 : i32
    return %arg0, %arg1, %arg2, %c0_i32 : i32, i32, i32, i32
  }
}

</mosaic_0001>

<bundles_post_ra>
// kernel: tpu_custom_call.1
= control target key start
LH: loop header
LB: loop body
LE: loop exit
PB: predicated region body
PF: predicated region fallthrough
CT: control target
= control target key end

     0   :  { %s1282_s0 = inlined_call_operand.hbm [shape: f32[2,2,8,32], index: 0, kind: input, shape index: {}]   ;;  %s1283_s1 = inlined_call_operand.hbm [shape: f32[2,2,8,32], index: 1, kind: input, shape index: {}]   ;;  %s1284_s2 = inlined_call_operand.hbm [shape: bf16[2,2,8,32], index: 2, kind: input, shape index: {}]   ;;  %s1285_s3 = inlined_call_operand.hbm [shape: f32[2,2,8,32], index: 3, kind: output, shape index: {}]  }
   0x1   :  { %1298 = sst [smem:[#allocation23_spill]] %s1282_s0 }
   0x2   :  { %1299 = sst [smem:[#allocation24_spill]] %s1283_s1 }
   0x3   :  { %8 = vsyncpa [#allocation7], 0 }
   0x4   :  { %10 = vsyncpa [#allocation7 + $0x1], 0 }
   0x5   :  { %11 = vsyncpa [#allocation10], 0 }
   0x6   :  { %13 = vsyncpa [#allocation10 + $0x1], 0 }
   0x7   :  { %14 = vsyncpa [#allocation8], 0 }
   0x8   :  { %16 = vsyncpa [#allocation8 + $0x1], 0  ;;  %s992_s12 = smov 0   ;;  %s994_s13 = smov 0  }
   0x9   :  { %s996_s14 = smov 0   ;;  %s998_s15 = smov 0  }
   0xa   :  { %s1000_s16 = smov 0   ;;  %s1002_s17 = smov 0  }
   0xb   :  { %s1004_s18 = smov 0   ;;  %s1006_s19 = smov 0  }
   0xc LB: > { %1300 = sst [smem:[#allocation16_spill]] %s942_s14  ;;  %s1033_s20 = sadd.s32 4294967295, %s962_s19   ;;  %s962_s19 = sphi %s1006_s19, %s22_s19   ;;  %s958_s18 = sphi %s1004_s18, %s1333_s18   ;;  %s954_s17 = sphi %s1002_s17, %s1332_s17   ;;  %s950_s16 = sphi %s1000_s16, %s1331_s16   ;;  %s946_s15 = sphi %s998_s15, %s1330_s15   ;;  %s942_s14 = sphi %s996_s14, %s1329_s14   ;;  %s938_s13 = sphi %s994_s13, %s1335_s13   ;;  %s934_s12 = sphi %s992_s12, %s1334_s12  }
   0xd   : > { %1301 = sst [smem:[#allocation17_spill]] %s954_s17  ;;  %s630_s21 = sadd.s32 4294967294, %s962_s19  }
   0xe   : > { %1302 = sst [smem:[#allocation18_spill]] %s958_s18  ;;  %s44_s22 = sadd.s32 1, %s954_s17 }
   0xf   : > { %s48_s23 = sadd.s32 1, %s958_s18  ;;  %p46_p0 = scmp.ge.s32.totalorder %s44_s22, 2 }
  0x10   : > { %s59_s24 = sadd.s32 1, %s942_s14  ;;  %p66_p1 = scmp.ne.s32.totalorder %s942_s14, %s938_s13 }
  0x11   : > { %p67_p2 = scmp.eq.s32.totalorder %s962_s19, 0  ;;  %s1337_s22 = smov (%p46_p0, %s44_s22), 0 }
  0x12   : > { %1303 = sst [smem:[#allocation19_spill]] %s1337_s22  ;;  %s1339_s23 = smov (!%p46_p0, %s48_s23), %s958_s18 }
  0x13   : > { %s53_s25 = ssub.s32 %s954_s17, %s1337_s22  ;;  %p1047_p3 = por %p67_p2, %p66_p1 }
  0x14   : > { %p50_p4 = scmp.ge.s32.totalorder %s1339_s23, 2  ;;  %p72_p5 = scmp.ne.s32.totalorder %s938_s13, %s934_s12 }
  0x15   : > { %p73_p6 = scmp.eq.s32.totalorder %s1033_s20, 0  ;;  %p160_p7 = scmp.eq.s32.totalorder %s1033_s20, 3 }
  0x16   : > { %s1341_s23 = smov (%p50_p4, %s1339_s23), 0  ;;  %p166_p10 = scmp.eq.s32.totalorder %s630_s21, 3 }
  0x17   : > { %1305 = sst [smem:[#allocation20_spill]] %s1341_s23  ;;  %p1057_p8 = por %p73_p6, %p72_p5 }
  0x18   : > { %p1061_p9 = por %p160_p7, %p66_p1  ;;  %s52_s29 = ssub.s32 %s958_s18, %s1341_s23 }
  0x19   : > { %s1306_s27 = scalar_select %p1057_p8, 1, 0 }
  0x1a   : > { %s1307_s28 = scalar_select %p1061_p9, 1, 0 }
  0x1b   : > { %s54_s30 = sor.u32 %s53_s25, %s52_s29  ;;  %p1067_p12 = por %p166_p10, %p72_p5 }
  0x1c   : > { %p57_p11 = scmp.eq.s32.totalorder %s54_s30, 0  ;;  %p692_p13 = scmp.lt.s32.totalorder %s962_s19, 4 }
  0x1d   : > { %s1308_s4 = scalar_select %p1067_p12, 1, 0 }
  0x1e   : > { %s1073_s5 = sand.u32 1, %s942_s14   ;;  %s634_s8 = sshll.u32 %s958_s18, 1 }
  0x1f   : > { %1309 = sst [smem:[#allocation21_spill]] %s1308_s4  ;;  %s1287_s7 = sshll.u32 %s1073_s5, 3 }
  0x20   : > { %s1076_s6 = scalar_select %p57_p11, %s942_s14, %s59_s24  }
  0x21   : > { %s1081_s9 = sadd.s32 %s954_s17, %s634_s8  ;;  %p1085_p0 = pnand %p692_p13, %p1047_p3 }
  0x22   : > { %1310 = sst [smem:[#allocation22_spill]] %s1076_s6  ;;  %s1288_s11 = sshll.u32 %s1081_s9, 7 }
  0x23   : > { %s1311_s10 = scalar_select %p1085_p0, 1, 0 }
  0x24   : > { %s207_s21 = sand.u32 1, %s962_s19   ;;  %s1312_s1 = sld [smem:[#allocation24_spill]] }
  0x25   : > { %s211_s26 = scalar_lea.vmem [#allocation9], %s1287_s7  ;;  %s1104_s8 = scalar_lea.sflag [#allocation10], %s207_s21 }
  0x26   : > { %s221_s30 = sshll.u32 %s211_s26, 4  ;;  %p1110_p4 = pneg %p1085_p0  ;;  %s1101_s30 = int_to_ptr.vmem [resolvable:$true] %s221_s30 }
  0x2a   : > { %s1096_s24 = scalar_lea.hbm %s1312_s1, %s1288_s11  ;;  %s775_s26 = scalar_lea.hbm %s1312_s1, 512 }
  0x2b   : > { %s770_s23 = scalar_lea.hbm %s1096_s24, 128  ;;  %p776_p7 = scmp.lt.u32.totalorder %s1096_s24, %s1312_s1 }
  0x2c   : > { %p771_p3 = scmp.ne.s32.totalorder %s1096_s24, %s770_s23  ;;  %p777_p10 = scmp.lt.u32.totalorder %s775_s26, %s770_s23 }
  0x2d   : > { %p779_p13 = scmp.lt.u32.totalorder %s770_s23, %s1096_s24 }
  0x2e   : > { %p773_p5 = pnand %p1110_p4, %p771_p3  ;;  %p778_p11 = por %p777_p10, %p776_p7 }
  0x30   : > { %p774_p6 = pneg %p773_p5  ;;  %p780_p1 = por %p779_p13, %p778_p11 }
  0x32   : > { %p781_p2 = pnand %p780_p1, %p774_p6 }
  0x34   : > { %784 = shalt.err (!%p781_p2)
}
  0x35   : > { %s785_s21 = scalar_lea.vmem %s1101_s30, 128  ;;  %s964_s7 = smov [#allocation9]  }
  0x36   : > { %p786_p3 = scmp.ne.s32.totalorder %s1101_s30, %s785_s21  ;;  %s790_s29 = sshll.u32 %s964_s7, 4  ;;  %s791_s29 = int_to_ptr.vmem [resolvable:$false] %s790_s29 }
  0x37   : > { %s792_s22 = scalar_lea.vmem %s791_s29, 256  ;;  %p793_p9 = scmp.lt.s32.totalorder %s1101_s30, %s791_s29 }
  0x38   : > { %p788_p5 = pnand %p786_p3, %p1110_p4  ;;  %p794_p8 = scmp.lt.s32.totalorder %s792_s22, %s785_s21 }
  0x3a   : > { %p789_p12 = pneg %p788_p5  ;;  %p795_p7 = por %p794_p8, %p793_p9 }
  0x3c   : > { %p796_p10 = pnand %p795_p7, %p789_p12 }
  0x3e   : > { %799 = shalt.err (!%p796_p10)
}
  0x3f   : > { %684 = dma.hbm_to_vmem [thread:$0]  (!%p1085_p0), %s1096_s24, 128, %s1101_s30, %s1104_s8  }
  0x40   : > { %p1314_p1 = scmp.lt.s32.totalorder %s962_s19, 5  ;;  %p1315_p2 = scmp.ge.s32.totalorder %s962_s19, 1 }
  0x41   : > { %s1317_s11 = sshll.u32 %s1081_s9, 7  ;;  %s1318_s0 = sld [smem:[#allocation23_spill]] }
  0x42   : > { %p1138_p6 = pnand %p1315_p2, %p1314_p1  ;;  %s1319_s29 = sshll.u32 %s1073_s5, 3 }
  0x43   : > { %s190_s22 = scalar_lea.vmem [#allocation6], %s1319_s29  ;;  %s187_s30 = scalar_lea.sflag [#allocation7], %s1073_s5 }
  0x44   : > { %s1316_s23 = scalar_select %p1138_p6, 1, 0 }
  0x45   : > { %s200_s1 = sshll.u32 %s190_s22, 4  ;;  %s201_s1 = int_to_ptr.vmem [resolvable:$true] %s200_s1 }
  0x47   : > { %s1147_s7 = scalar_lea.hbm %s1318_s0, %s1317_s11  ;;  %s805_s11 = scalar_lea.hbm %s1318_s0, 512 }
  0x48   : > { %s800_s18 = scalar_lea.hbm %s1147_s7, 128  ;;  %p806_p11 = scmp.lt.u32.totalorder %s1147_s7, %s1318_s0 }
  0x49   : > { %p801_p8 = scmp.ne.s32.totalorder %s1147_s7, %s800_s18  ;;  %p807_p13 = scmp.lt.u32.totalorder %s805_s11, %s800_s18 }
  0x4a   : > { %p809_p5 = scmp.lt.u32.totalorder %s800_s18, %s1147_s7 }
  0x4b   : > { %p803_p9 = pnand %p801_p8, %p1110_p4  ;;  %p808_p3 = por %p807_p13, %p806_p11 }
  0x4d   : > { %p804_p12 = pneg %p803_p9  ;;  %p810_p7 = por %p809_p5, %p808_p3 }
  0x4f   : > { %p811_p10 = pnand %p810_p7, %p804_p12 }
  0x51   : > { %814 = shalt.err (!%p811_p10)
}
  0x52   : > { %s815_s29 = scalar_lea.vmem %s201_s1, 128  ;;  %s965_s22 = smov [#allocation6]  }
  0x53   : > { %p816_p1 = scmp.ne.s32.totalorder %s201_s1, %s815_s29  ;;  %s820_s24 = sshll.u32 %s965_s22, 4  ;;  %s821_s24 = int_to_ptr.vmem [resolvable:$false] %s820_s24 }
  0x54   : > { %s822_s17 = scalar_lea.vmem %s821_s24, 256  ;;  %p823_p9 = scmp.lt.s32.totalorder %s201_s1, %s821_s24 }
  0x55   : > { %p818_p2 = pnand %p816_p1, %p1110_p4  ;;  %p824_p6 = scmp.lt.s32.totalorder %s822_s17, %s815_s29 }
  0x57   : > { %p819_p8 = pneg %p818_p2  ;;  %p825_p0 = por %p824_p6, %p823_p9 }
  0x59   : > { %p826_p11 = pnand %p825_p0, %p819_p8 }
  0x5b   : > { %829 = shalt.err (!%p826_p11)
}
  0x5c   : > { %p1320_p13 = scmp.ne.s32.totalorder %s1311_s10, 0  ;;  %s641_s18 = sshll.u32 %s1081_s9, 6 }
  0x5d   : > { %s1321_s6 = sshll.u32 %s1073_s5, 2  ;;  %s240_s0 = scalar_lea.hbm %s1284_s2, %s641_s18 }
  0x5e   : > { %681 = dma.hbm_to_vmem [thread:$0]  (!%p1320_p13), %s1147_s7, 128, %s201_s1, %s187_s30  }
  0x5f   : > { %s232_s11 = scalar_lea.vmem [#allocation11], %s1321_s6  ;;  %s830_s24 = scalar_lea.hbm %s240_s0, 64 }
  0x60   : > { %s242_s26 = sshll.u32 %s232_s11, 4  ;;  %p831_p6 = scmp.ne.s32.totalorder %s240_s0, %s830_s24  ;;  %s243_s26 = int_to_ptr.vmem [resolvable:$true] %s242_s26 }
  0x61   : > { %s835_s14 = scalar_lea.hbm %s1284_s2, 256  ;;  %p836_p3 = scmp.lt.u32.totalorder %s240_s0, %s1284_s2 }
  0x62   : > { %p833_p0 = pnand %p831_p6, %p1110_p4  ;;  %p837_p5 = scmp.lt.u32.totalorder %s835_s14, %s830_s24 }
  0x63   : > { %p839_p10 = scmp.lt.u32.totalorder %s830_s24, %s240_s0 }
  0x64   : > { %p834_p12 = pneg %p833_p0  ;;  %p838_p7 = por %p837_p5, %p836_p3 }
  0x66   : > { %p840_p1 = por %p839_p10, %p838_p7 }
  0x68   : > { %p841_p2 = pnand %p840_p1, %p834_p12 }
  0x6a   : > { %844 = shalt.err (!%p841_p2)
}
  0x6b   : > { %s845_s5 = scalar_lea.vmem %s243_s26, 64  ;;  %s966_s9 = smov [#allocation11]  }
  0x6c   : > { %p846_p8 = scmp.ne.s32.totalorder %s243_s26, %s845_s5  ;;  %s850_s7 = sshll.u32 %s966_s9, 4  ;;  %s851_s7 = int_to_ptr.vmem [resolvable:$false] %s850_s7 }
  0x6d   : > { %s852_s30 = scalar_lea.vmem %s851_s7, 128  ;;  %p853_p6 = scmp.lt.s32.totalorder %s243_s26, %s851_s7 }
  0x6e   : > { %p848_p9 = pnand %p846_p8, %p1110_p4  ;;  %p854_p0 = scmp.lt.s32.totalorder %s852_s30, %s845_s5 }
  0x70   : > { %p849_p11 = pneg %p848_p9  ;;  %p855_p13 = por %p854_p0, %p853_p6 }
  0x72   : > { %p856_p3 = pnand %p855_p13, %p849_p11 }
  0x74   : > { %859 = shalt.err (!%p856_p3)
}
  0x75   : > { %p1322_p5 = scmp.ne.s32.totalorder %s1311_s10, 0  ;;  %p1323_p12 = scmp.ne.s32.totalorder %s1316_s23, 0 }
  0x76   : > { %s1192_s14 = sand.u32 (!%p1323_p12), 1, %s938_s13   ;;  %p1324_p4 = scmp.ne.s32.totalorder (!%p1323_p12), %s1306_s27, 0 }
  0x77   : > { %687 = dma.hbm_to_vmem [thread:$0]  (!%p1322_p5), %s240_s0, 64, %s243_s26, %s1104_s8  }
  0x78   : > { %251 = sbr.rel (%p1323_p12) target bundleno = 952 (0x3b8), region = 32  ;;  %s1195_s4 = sshll.u32 (!%p1323_p12), %s1192_s14, 3 }
  0x79   : > { %s254_s25 = scalar_lea.sflag (!%p1323_p12), [#allocation7], %s1192_s14  ;;  %s257_s18 = scalar_lea.vmem (!%p1323_p12), [#allocation6], %s1195_s4 }
  0x7f   : > { %921 = dma.done.wait (%p1324_p4), %s254_s25, 128  }
  0x80   : > { %923 = vsyncadd (%p1324_p4), %s254_s25, 4294967168  ;;  %s262_s0 = sand.u32 1, %s1033_s20   ;;  %s266_s8 = scalar_lea.vmem [#allocation9], %s1195_s4 }
  0x81   : > { %s263_s10 = scalar_lea.sflag [#allocation10], %s262_s0 }
  0x82   : > { %925 = dma.done.wait (%p1324_p4), %s263_s10, 192  }
  0x83   : > { %927 = vsyncadd (%p1324_p4), %s263_s10, 4294967104  ;;  %vm321_vm0 = vcmask 261120   ;;  %v967_v0 = vmov 0.0   ;;  %vm968_vm1 = vmmov 0   ;;  %v323_v1 = vld [vmem:[%s266_s8] sm:$0xff]  ;;  %v313_v2 = vld [vmem:[%s257_s18] sm:$0xff] }
  0x84   : > { %658 = vmatprep.subr.bf16.mxu0 %v967_v0  ;;  %322 = vst.msk [vmem:[#allocation5] sm:$0xff] %vm321_vm0, %v967_v0  ;;  %660 = vmatprep.mubr.msk.bf16.mxu0 %vm968_vm1, %v967_v0  ;;  %v324_v3 = vpack.c.bf16 %v323_v1, %v323_v1  ;;  %v314_v4 = vmul.f32 0.17677669, %v313_v2  ;;  %vm316_vm2 = vcmask 257024   ;;  %vm318_vm3 = vcmask 7168   ;;  %s645_s20 = sshll.u32 %s1192_s14, 2 }
  0x85   : > { %664 = vmatprep.subr.bf16.mxu1 %v967_v0  ;;  %666 = vmatprep.mubr.msk.bf16.mxu1 %vm968_vm1, %v967_v0  ;;  %v969_v8 = vmov -inf   ;;  %320 = vst.msk [vmem:[#allocation4] sm:$0xff] %vm318_vm3, %v967_v0  ;;  %vm374_vm4 = vcmask 64512   ;;  %v970_v14 = vmov 0   ;;  %vm410_vm5 = vcmask 1043456   ;;  %s275_s27 = scalar_lea.vmem [#allocation11], %s645_s20 }
  0x86   : > { %v331_v5 = vsel %vm321_vm0, %v324_v3, 0  ;;  %v315_v6 = vpack.c.bf16 %v314_v4, %v314_v4  ;;  %319 = vst.msk [vmem:[#allocation3] sm:$0xff] %vm318_vm3, %v969_v8  ;;  %762 = vset.pattern.permute.xlu0 %v970_v14  ;;  %763 = vset.pattern.permute.xlu1 %v970_v14  ;;  %v406_v19 = vld [vmem:[%s275_s27] sm:$0xf]  ;;  %s650_s23 = sshll.u32 %s950_s16, 1  ;;  %s307_s26 = scalar_lea.vmem [#allocation12], %s1195_s4 }
  0x87   : > { %659 = vmatpush3.bf16.xpose.msra.mxu0 %v331_v5  ;;  %v412_v20 = vsel %vm410_vm5, %v406_v19, 0  ;;  %s483_s6 = sadd.s32 %s946_s15, %s650_s23  ;;  %s487_s21 = sshll.u32 %s307_s26, 4  ;;  %s1229_s21 = int_to_ptr.vmem [resolvable:$true] %s487_s21 }
  0x88   : > { %317 = vst.msk [vmem:[#allocation2] sm:$0xf] %vm316_vm2, %v315_v6  ;;  %665 = vmatpush3.bf16.msra.mxu1 %v412_v20  ;;  %s651_s11 = sshll.u32 %s483_s6, 7  ;;  %s471_s16 = scalar_lea.sflag [#allocation8], %s1192_s14 }
  0x89   : > { %s1227_s29 = scalar_lea.hbm %s1285_s3, %s651_s11  ;;  %s860_s15 = scalar_lea.vmem %s1229_s21, 128 }
  0x8a   : > { %p861_p13 = scmp.ne.s32.totalorder %s1229_s21, %s860_s15  ;;  %p1325_p7 = scmp.ne.s32.totalorder %s1307_s28, 0 }
  0x8b   : > { %v398_v35 = vld [vmem:[#allocation5] sm:$0xff]  ;;  %s971_s17 = smov [#allocation12]  }
  0x8c   : > { %v390_v29 = vld [vmem:[#allocation4] sm:$0xff]  ;;  %p862_p10 = pnand %p861_p13, %p1325_p7  ;;  %s864_s1 = sshll.u32 %s971_s17, 4  ;;  %s865_s1 = int_to_ptr.vmem [resolvable:$false] %s864_s1 }
  0x8d   : > { %v373_v15 = vld [vmem:[#allocation3] sm:$0xff]  ;;  %s866_s5 = scalar_lea.vmem %s865_s1, 256  ;;  %p867_p2 = scmp.lt.s32.totalorder %s1229_s21, %s865_s1 }
  0x8e   : > { %p863_p1 = pneg %p862_p10  ;;  %p868_p8 = scmp.lt.s32.totalorder %s866_s5, %s860_s15 }
  0x8f   : > { %v325_v7 = vld [vmem:[#allocation2] sm:$0xf] }
  0x90   : > { %661 = vmatmul.mubr.msk.bf16.vlgmr.msra.gmra.mrb[0].mxu0 %vm321_vm0, %v325_v7  ;;  %p869_p9 = por %p868_p8, %p867_p2 }
  0x92   : > { %p870_p11 = pnand %p869_p9, %p863_p1 }
 0x163   : > { %v367_v9 = vpop.f32.mrb[0].mxu0 }
 0x164   : > { %v662_v10 = vpop.f32.mrb[1].mxu0  ;;  %v375_v11 = vsel %vm374_vm4, %v367_v9, -inf }
 0x165   : > { %376 = vmax.xlane.f32.xlu0 %v375_v11  ;;  %v370_v12 = vpop.f32.mrb[2].mxu0 }
 0x166   : > { %v663_v13 = vpop.f32.mrb[3].mxu0 }
 0x1f2   : > { %v377_v16 = vpop.xlane.xlu0 %376 }
 0x1f3   : > { %v378_v17 = vmax.f32 %v373_v15, %v377_v16 }
 0x1f5   : > { %v379_v18 = vsub.f32 %v373_v15, %v378_v17  ;;  %456 = vst.msk [vmem:[#allocation3] sm:$0xff] %vm318_vm3, %v378_v17  ;;  %384 = vperm.xlu0 %762, %v378_v17  }
 0x1f7   : > { %v380_v27 = vmul.f32 1.442695, %v379_v18 }
 0x274   : > { %v385_v21 = vpop.permute.xlu0 %384 }
 0x275   : > { %v387_v22 = vsub.f32 %v367_v9, %v385_v21 }
 0x277   : > { %v388_v23 = vmul.f32 1.442695, %v387_v22 }
 0x279   : > { %764 = vpow2.f32 %v388_v23 }
 0x27a   : > { %766 = vpow2.f32 %v380_v27 }
 0x283   : > { %v765_v24 = vpop.eup %764 }
 0x284   : > { %v392_v25 = vsel %vm374_vm4, %v765_v24, 0.0  ;;  %v405_v26 = vpack.c.bf16 %v765_v24, %v765_v24  ;;  %v767_v28 = vpop.eup %766 }
 0x285   : > { %393 = vadd.xlane.f32.xlu1 %v392_v25  ;;  %v391_v30 = vmul.f32 %v767_v28, %v390_v29 }
 0x286   : > { %667 = vmatmul.mubr.msk.bf16.vlgmr.msra.gmra.mrb[0].mxu1 %vm374_vm4, %v405_v26 }
 0x296   : > { %401 = vperm.xlu1 %763, %v767_v28  }
 0x312   : > { %v394_v31 = vpop.xlane.xlu1 %393 }
 0x313   : > { %v395_v32 = vadd.f32 %v394_v31, %v391_v30 }
 0x315   : > { %397 = vst.msk [vmem:[#allocation4] sm:$0xff] %vm318_vm3, %v395_v32 }
 0x316   : > { %v402_v36 = vpop.permute.xlu1 %401 }
 0x317   : > { %v404_v37 = vmul.f32 %v402_v36, %v398_v35 }
 0x31c   : > { %v460_v33 = vld [vmem:[#allocation4] sm:$0xff] }
 0x31d   : > { %768 = vrcp.f32 %v460_v33 }
 0x327   : > { %v769_v34 = vpop.eup %768 }
 0x328   : > { %465 = vperm.xlu1 %763, %v769_v34  }
 0x359   : > { %v448_v38 = vpop.f32.mrb[0].mxu1 }
 0x35a   : > { %v454_v39 = vadd.f32 %v448_v38, %v404_v37  ;;  %v668_v40 = vpop.f32.mrb[1].mxu1 }
 0x35b   : > { %v451_v41 = vpop.f32.mrb[2].mxu1 }
 0x35c   : > { %455 = vst.msk [vmem:[#allocation5] sm:$0xff] %vm321_vm0, %v454_v39  ;;  %v669_v42 = vpop.f32.mrb[3].mxu1 }
 0x363   : > { %v462_v43 = vld [vmem:[#allocation5] sm:$0xff] }
 0x3a7   : > { %v466_v44 = vpop.permute.xlu1 %465 }
 0x3a8   : > { %v468_v45 = vmul.f32 %v466_v44, %v462_v43 }
 0x3aa   : > { %469 = vst.msk [vmem:[%s307_s26] sm:$0xff] %vm321_vm0, %v468_v45 }
 0x3ab   : > { %873 = shalt.err (!%p870_p11)
}
 0x3ac   : > { %s874_s9 = scalar_lea.hbm %s1227_s29, 128  ;;  %s878_s14 = scalar_lea.hbm %s1285_s3, 512 }
 0x3ad   : > { %p875_p6 = scmp.ne.s32.totalorder %s1227_s29, %s874_s9  ;;  %p879_p5 = scmp.lt.u32.totalorder %s1227_s29, %s1285_s3 }
 0x3ae   : > { %p880_p12 = scmp.lt.u32.totalorder %s878_s14, %s874_s9  ;;  %p882_p13 = scmp.lt.u32.totalorder %s874_s9, %s1227_s29 }
 0x3af   : > { %p876_p0 = pnand %p875_p6, %p1325_p7 }
 0x3b0   : > { %p881_p4 = por %p880_p12, %p879_p5 }
 0x3b1   : > { %p877_p3 = pneg %p876_p0 }
 0x3b2   : > { %p883_p10 = por %p882_p13, %p881_p4 }
 0x3b4   : > { %p884_p1 = pnand %p883_p10, %p877_p3 }
 0x3b6   : > { %887 = shalt.err (!%p884_p1)
}
 0x3b7   : > { %676 = dma.vmem_to_hbm [thread:$0]  (%p1325_p7), %s1229_s21, 128, %s1227_s29, %s471_s16  }
 0x3b8 PF: > { %s1326_s18 = sld [smem:[#allocation21_spill]]  ;;  %p693_p2 = scmp.ge.s32.totalorder %s962_s19, 2 }
 0x3b9   : > { %s499_s0 = sand.u32 1, %s934_s12  }
 0x3ba   : > { %s500_s10 = scalar_lea.sflag [#allocation8], %s499_s0 }
 0x3be   : > { %p1327_p8 = scmp.ne.s32.totalorder %s1326_s18, 0 }
 0x3c0   : > { %p689_p9 = pnand %p693_p2, %p1327_p8 }
 0x3c2   : > { %929 = dma.done.wait (!%p689_p9), %s500_s10, 128  }
 0x3c3   : > { %931 = vsyncadd (!%p689_p9), %s500_s10, 4294967168  ;;  %s22_s19 = sadd.s32 1, %s962_s19   ;;  %s1328_s8 = sld [smem:[#allocation16_spill]] }
 0x3c4   : > { %p19_p11 = scmp.ge.s32.totalorder %s22_s19, 6   ;;  %s1329_s14 = sld [smem:[#allocation22_spill]] }
 0x3c5   : > { %s1330_s15 = sld [smem:[#allocation17_spill]]  ;;  %s1331_s16 = sld [smem:[#allocation18_spill]] }
 0x3c6   : > { %s1332_s17 = sld [smem:[#allocation19_spill]]  ;;  %s1333_s18 = sld [smem:[#allocation20_spill]] }
 0x3c7   : > { %s1334_s12 = smov %s938_s13  ;;  %21 = sbr.rel (!%p19_p11) target bundleno = 12 (0xc), region = 109 }
 0x3c9   : > { %s1335_s13 = smov %s1328_s8 }
 0x3ce   :  { %505 = vsyncpa [#allocation7], 1 }
 0x3cf   :  { %507 = vsyncpa [#allocation7 + $0x1], 1 }
 0x3d0   :  { %508 = vsyncpa [#allocation10], 1 }
 0x3d1   :  { %510 = vsyncpa [#allocation10 + $0x1], 1 }
 0x3d2   :  { %511 = vsyncpa [#allocation8], 1 }
 0x3d3   :  { %513 = vsyncpa [#allocation8 + $0x1], 1 }

</bundles_post_ra>
